<compile_context>
chip_gen: v7x
topology: tpu7x:2x2x1
jax: 0.10.0
libtpu: 0.0.40
codegen_flags: <defaults>
</compile_context>

<pallas_src>
import functools

import jax
import jax.numpy as jnp
from jax.experimental import pallas as pl
from jax.experimental.pallas import tpu as pltpu


def _round_up_lanes(n):
    return pl.cdiv(n, 128) * 128


def _bias_layout(F, H, Z):
    """Lane-aligned offsets for [b1 | b_head | bd1 | bd2] packed into one row."""
    widths = (H, 2 * Z, H, F)
    offs, o = [], 0
    for w in widths:
        offs.append(o)
        o += _round_up_lanes(w)
    return tuple(offs), o


def _out_layout(F, Z):
    """Two lane-dense segments: [recon | pad] [z | mu | log_sigma | nelbo | pad]."""
    seg0 = _round_up_lanes(F)              # recon segment
    tail = 3 * Z + 1                        # z | mu | log_sigma | per-row nelbo
    seg1 = _round_up_lanes(tail)
    return seg0, seg1, seg0 + seg1


def vae_kernel(xn_ref, w1_ref, wh_ref, wd1_ref, wd2_ref, b_ref, out_ref,
               *, F, H, Z, b_offs, pad_recon, pad_tail):
    ob1, obh, obd1, obd2 = b_offs

    xn = xn_ref[...]                                   # (TB, Wx) bf16: [x | noise | pad]
    x_bf = xn[:, :F]                                   # bf16, MXU operand
    noise = xn[:, F:F + Z].astype(jnp.float32)         # f32 for the elementwise path
    x_f32 = x_bf.astype(jnp.float32)                   # BCE target

    # ------------- encoder: hidden + fused (mu | log_sigma) head -------------
    h = jnp.dot(x_bf, w1_ref[...], preferred_element_type=jnp.float32) + b_ref[:, ob1:ob1 + H]
    h = jnp.maximum(h, 0.0)                                             # (TB, H) f32
    head = (jnp.dot(h.astype(jnp.bfloat16), wh_ref[...],
                    preferred_element_type=jnp.float32)
            + b_ref[:, obh:obh + 2 * Z])                                # (TB, 2Z) f32
    mu = head[:, :Z]
    log_sigma = head[:, Z:]

    # ------------- reparameterization -------------
    sigma = jnp.exp(log_sigma)                                          # reused by KL
    z = mu + sigma * noise                                              # (TB, Z) f32

    # ------------- decoder -------------
    hd = (jnp.dot(z.astype(jnp.bfloat16), wd1_ref[...],
                  preferred_element_type=jnp.float32)
          + b_ref[:, obd1:obd1 + H])
    hd = jnp.maximum(hd, 0.0)                                           # (TB, H) f32
    logits = (jnp.dot(hd.astype(jnp.bfloat16), wd2_ref[...],
                      preferred_element_type=jnp.float32)
              + b_ref[:, obd2:obd2 + F])                                # (TB, F) f32

    # ------------- shared exp for sigmoid + stable BCE -------------
    e = jnp.exp(-jnp.abs(logits))                                       # one EUP exp pass
    r = pl.reciprocal(1.0 + e, approx=True)                             # 1 / (1 + e)
    p = jnp.where(logits >= 0.0, r, e * r)                              # sigmoid(logits)
    softplus = jnp.log1p(e)                                             # log(1 + exp(-|l|))

    # ------------- losses -------------
    # KL exactly as the reference module: 0.5 * sum(exp(ls) + mu^2 - ls - 1, dim=1)
    l_reg = 0.5 * jnp.sum(sigma + mu * mu - log_sigma - 1.0, axis=1, keepdims=True)
    # BCE(sigmoid(logits), x) from logits (stable); matches BCELoss except its -100 clamp.
    bce = jnp.maximum(logits, 0.0) - logits * x_f32 + softplus          # (TB, F)
    per_row_nelbo = jnp.sum(bce, axis=1, keepdims=True) + l_reg         # (TB, 1)

    # ------------- single lane-dense unmasked output store -------------
    tb = p.shape[0]
    parts = [p]
    if pad_recon:
        parts.append(jnp.zeros((tb, pad_recon), jnp.float32))
    parts += [z, head, per_row_nelbo]                                   # head = [mu | ls]
    if pad_tail:
        parts.append(jnp.zeros((tb, pad_tail), jnp.float32))
    out_ref[...] = jnp.concatenate(parts, axis=1)                       # (TB, W), one vst pass


def pack_params(params):
    """One-time packing: fused bf16 head weight, bf16 weights, single f32 bias buffer."""
    F = params["wd2"].shape[1]
    H = params["w1"].shape[1]
    Z = params["w_mu"].shape[1]
    b_offs, b_width = _bias_layout(F, H, Z)

    w_head = jnp.concatenate([params["w_mu"], params["w_ls"]], axis=1)   # (H, 2Z)
    b_head = jnp.concatenate([params["b_mu"], params["b_ls"]], axis=1)   # (1, 2Z)

    b_packed = jnp.zeros((1, b_width), jnp.float32)
    for off, b in zip(b_offs, (params["b1"], b_head, params["bd1"], params["bd2"])):
        b_packed = jax.lax.dynamic_update_slice(b_packed, b, (0, off))

    to_bf16 = lambda w: w.astype(jnp.bfloat16)
    return dict(w1=to_bf16(params["w1"]), w_head=to_bf16(w_head),
                wd1=to_bf16(params["wd1"]), wd2=to_bf16(params["wd2"]),
                b_packed=b_packed)


def vae_forward(x, noise, packed, *, tb=None):
    B, F = x.shape
    Z = noise.shape[1]
    H = packed["w1"].shape[1]
    if tb is None:
        tb = B if B <= 256 else 256
    assert B % tb == 0
    assert tb == B or tb % 16 == 0, "bf16 input tiles want tb % 16 == 0 (or tb == B)"

    b_offs, b_width = _bias_layout(F, H, Z)
    seg0, seg1, W = _out_layout(F, Z)
    Wx = _round_up_lanes(F + Z)

    # Pack x and noise into one bf16 input slab (wrapper-side layout plumbing).
    xn = jnp.zeros((B, Wx), jnp.bfloat16)
    xn = jax.lax.dynamic_update_slice(xn, x.astype(jnp.bfloat16), (0, 0))
    xn = jax.lax.dynamic_update_slice(xn, noise.astype(jnp.bfloat16), (0, F))

    kernel = functools.partial(vae_kernel, F=F, H=H, Z=Z, b_offs=b_offs,
                               pad_recon=seg0 - F, pad_tail=seg1 - (3 * Z + 1))

    tiled = lambda i: (i, 0)      # batch-tiled arrays
    const = lambda i: (0, 0)      # VMEM-resident params (same block every grid step)

    slab = pl.pallas_call(
        kernel,
        out_shape=jax.ShapeDtypeStruct((B, W), jnp.float32),
        grid_spec=pltpu.PrefetchScalarGridSpec(
            num_scalar_prefetch=0,
            grid=(B // tb,),
            in_specs=[
                pl.BlockSpec((tb, Wx), tiled),         # [x | noise] slab (bf16)
                pl.BlockSpec((F, H), const),           # w1 (bf16)
                pl.BlockSpec((H, 2 * Z), const),       # fused mu/log_sigma head weight (bf16)
                pl.BlockSpec((Z, H), const),           # wd1 (bf16)
                pl.BlockSpec((H, F), const),           # wd2 (bf16)
                pl.BlockSpec((1, b_width), const),     # packed biases (f32)
            ],
            out_specs=pl.BlockSpec((tb, W), tiled),
        ),
        compiler_params=pltpu.CompilerParams(
            dimension_semantics=("parallel",)),
    )(xn, packed["w1"], packed["w_head"], packed["wd1"], packed["wd2"],
      packed["b_packed"])

    # Unpack the lane-dense slab (wrapper-side only; padded lanes never read).
    recon = slab[:, :F]
    z = slab[:, seg0:seg0 + Z]
    mu = slab[:, seg0 + Z:seg0 + 2 * Z]
    log_sigma = slab[:, seg0 + 2 * Z:seg0 + 3 * Z]
    average_negative_elbo = jnp.mean(slab[:, seg0 + 3 * Z])
    return average_negative_elbo, z, recon, mu, log_sigma


def init_params(key, f_dim, h_dim, z_dim):
    """Deterministic PyTorch-Linear-style uniform init: U(-1/sqrt(fan_in), 1/sqrt(fan_in))."""
    def linear(k, fan_in, fan_out):
        kw, kb = jax.random.split(k)
        bound = 1.0 / jnp.sqrt(jnp.float32(fan_in))
        w = jax.random.uniform(kw, (fan_in, fan_out), jnp.float32, -bound, bound)
        b = jax.random.uniform(kb, (1, fan_out), jnp.float32, -bound, bound)
        return w, b

    keys = jax.random.split(key, 5)
    w1, b1 = linear(keys[0], f_dim, h_dim)        # encoder hidden
    w_mu, b_mu = linear(keys[1], h_dim, z_dim)    # mu head
    w_ls, b_ls = linear(keys[2], h_dim, z_dim)    # log_sigma head
    wd1, bd1 = linear(keys[3], z_dim, h_dim)      # decoder hidden
    wd2, bd2 = linear(keys[4], h_dim, f_dim)      # decoder output (pre-sigmoid)
    return dict(w1=w1, b1=b1, w_mu=w_mu, b_mu=b_mu, w_ls=w_ls, b_ls=b_ls,
                wd1=wd1, bd1=bd1, wd2=wd2, bd2=bd2)


def vae_reference(x, noise, params):
    """Pure-JAX f32 reference of the module's forward (for correctness checking)."""
    hp = jax.lax.Precision.HIGHEST
    relu = lambda a: jnp.maximum(a, 0.0)
    h = relu(jnp.dot(x, params["w1"], precision=hp) + params["b1"])
    mu = jnp.dot(h, params["w_mu"], precision=hp) + params["b_mu"]
    log_sigma = jnp.dot(h, params["w_ls"], precision=hp) + params["b_ls"]
    z = mu + jnp.exp(log_sigma) * noise
    hd = relu(jnp.dot(z, params["wd1"], precision=hp) + params["bd1"])
    logits = jnp.dot(hd, params["wd2"], precision=hp) + params["bd2"]
    p = jax.nn.sigmoid(logits)
    l_reg = 0.5 * jnp.sum(jnp.exp(log_sigma) + mu ** 2 - log_sigma - 1.0, axis=1)
    log_p = jnp.maximum(jnp.log(p), -100.0)
    log_1mp = jnp.maximum(jnp.log(1.0 - p), -100.0)
    l_recon = jnp.sum(-(x * log_p + (1.0 - x) * log_1mp), axis=1)
    return jnp.mean(l_recon + l_reg), z, p, mu, log_sigma


if __name__ == "__main__":
    # x_dim = (64,) -> 1D (vector) VAE; z_dim = (16,); hidden = 32;
    # batch = 32 with TB = 16 -> grid = (2,): bf16-friendly sublane count and an even
    # grid so both v7x TensorCores get work (no-op on v5e/v6e).
    B, F, H, Z = 32, 64, 32, 16
    TB = 16

    key = jax.random.PRNGKey(0)
    k_x, k_noise, k_params = jax.random.split(key, 3)

    x = jax.random.uniform(k_x, (B, F), jnp.float32)          # data in [0, 1] (BCE target)
    noise = jax.random.normal(k_noise, (B, Z), jnp.float32)   # reparameterization noise
    params = init_params(k_params, F, H, Z)
    packed = pack_params(params)                              # one-time packing (bf16 weights)

    elbo, z, recon, mu, log_sigma = vae_forward(x, noise, packed, tb=TB)
    jax.block_until_ready((elbo, z, recon, mu, log_sigma))

    assert elbo.shape == ()
    assert z.shape == (B, Z) and mu.shape == (B, Z) and log_sigma.shape == (B, Z)
    assert recon.shape == (B, F)
    assert bool(jnp.isfinite(elbo))

    # correctness check vs. the pure-JAX f32 reference (bf16 matmul path => 2e-2 tolerance)
    r_elbo, r_z, r_recon, r_mu, r_ls = vae_reference(x, noise, params)
    assert jnp.allclose(elbo, r_elbo, rtol=2e-2, atol=2e-2)
    assert jnp.allclose(z, r_z, rtol=2e-2, atol=2e-2)
    assert jnp.allclose(recon, r_recon, rtol=2e-2, atol=2e-2)
    assert jnp.allclose(mu, r_mu, rtol=2e-2, atol=2e-2)
    assert jnp.allclose(log_sigma, r_ls, rtol=2e-2, atol=2e-2)

    print("KERNEL_OK")
</pallas_src>

<mosaic_0001>
module attributes {stable_mosaic.version = 11 : i64} {
  func.func @vae_kernel(%arg0: i32, %arg1: memref<16x128xbf16, #tpu.memory_space<vmem>>, %arg2: memref<64x32xbf16, #tpu.memory_space<vmem>>, %arg3: memref<32x32xbf16, #tpu.memory_space<vmem>>, %arg4: memref<16x32xbf16, #tpu.memory_space<vmem>>, %arg5: memref<32x64xbf16, #tpu.memory_space<vmem>>, %arg6: memref<1x512xf32, #tpu.memory_space<vmem>>, %arg7: memref<16x256xf32, #tpu.memory_space<vmem>>) attributes {dimension_semantics = [#tpu.dimension_semantics<parallel>], iteration_bounds = array<i64: 2>, scalar_prefetch = 0 : i64, scratch_operands = 0 : i64, tpu.core_type = #tpu.core_type<tc>, window_params = [{transform_indices = @transform_0, window_bounds = array<i64: 16, 128>}, {pipeline_mode = #tpu.pipeline_mode<synchronous>, transform_indices = @transform_1, window_bounds = array<i64: 64, 32>}, {pipeline_mode = #tpu.pipeline_mode<synchronous>, transform_indices = @transform_2, window_bounds = array<i64: 32, 32>}, {pipeline_mode = #tpu.pipeline_mode<synchronous>, transform_indices = @transform_3, window_bounds = array<i64: 16, 32>}, {pipeline_mode = #tpu.pipeline_mode<synchronous>, transform_indices = @transform_4, window_bounds = array<i64: 32, 64>}, {pipeline_mode = #tpu.pipeline_mode<synchronous>, transform_indices = @transform_5, window_bounds = array<i64: 1, 512>}, {transform_indices = @transform_6, window_bounds = array<i64: 16, 256>}]} {
    %c0 = arith.constant 0 : index
    %c0_0 = arith.constant 0 : index
    %0 = vector.load %arg1[%c0, %c0_0] : memref<16x128xbf16, #tpu.memory_space<vmem>>, vector<16x128xbf16>
    %1 = vector.extract_strided_slice %0 {offsets = [0, 0], sizes = [16, 64], strides = [1, 1]} : vector<16x128xbf16> to vector<16x64xbf16>
    %2 = vector.extract_strided_slice %0 {offsets = [0, 64], sizes = [16, 16], strides = [1, 1]} : vector<16x128xbf16> to vector<16x16xbf16>
    %3 = arith.extf %2 : vector<16x16xbf16> to vector<16x16xf32>
    %4 = arith.extf %1 : vector<16x64xbf16> to vector<16x64xf32>
    %c0_1 = arith.constant 0 : index
    %c0_2 = arith.constant 0 : index
    %5 = vector.load %arg2[%c0_1, %c0_2] : memref<64x32xbf16, #tpu.memory_space<vmem>>, vector<64x32xbf16>
    %cst = arith.constant dense<0.000000e+00> : vector<16x32xf32>
    %6 = tpu.matmul %1, %5, %cst {dimension_numbers = #tpu.dot_dimension_numbers<[1], [0], [0], [1], [0, 0, 1, 1], [], []>} : vector<16x64xbf16>, vector<64x32xbf16>, vector<16x32xf32> -> vector<16x32xf32>
    %c0_3 = arith.constant 0 : index
    %c0_4 = arith.constant 0 : index
    %7 = vector.load %arg6[%c0_3, %c0_4] : memref<1x512xf32, #tpu.memory_space<vmem>>, vector<1x32xf32>
    %8 = vector.broadcast %7 : vector<1x32xf32> to vector<16x32xf32>
    %9 = arith.addf %6, %8 : vector<16x32xf32>
    %cst_5 = arith.constant 0.000000e+00 : f32
    %10 = vector.broadcast %cst_5 : f32 to vector<16x32xf32>
    %11 = arith.maximumf %9, %10 : vector<16x32xf32>
    %12 = arith.truncf %11 : vector<16x32xf32> to vector<16x32xbf16>
    %c0_6 = arith.constant 0 : index
    %c0_7 = arith.constant 0 : index
    %13 = vector.load %arg3[%c0_6, %c0_7] : memref<32x32xbf16, #tpu.memory_space<vmem>>, vector<32x32xbf16>
    %cst_8 = arith.constant dense<0.000000e+00> : vector<16x32xf32>
    %14 = tpu.matmul %12, %13, %cst_8 {dimension_numbers = #tpu.dot_dimension_numbers<[1], [0], [0], [1], [0, 0, 1, 1], [], []>} : vector<16x32xbf16>, vector<32x32xbf16>, vector<16x32xf32> -> vector<16x32xf32>
    %c0_9 = arith.constant 0 : index
    %c128 = arith.constant 128 : index
    %15 = vector.load %arg6[%c0_9, %c128] : memref<1x512xf32, #tpu.memory_space<vmem>>, vector<1x32xf32>
    %16 = vector.broadcast %15 : vector<1x32xf32> to vector<16x32xf32>
    %17 = arith.addf %14, %16 : vector<16x32xf32>
    %18 = vector.extract_strided_slice %17 {offsets = [0, 0], sizes = [16, 16], strides = [1, 1]} : vector<16x32xf32> to vector<16x16xf32>
    %19 = vector.extract_strided_slice %17 {offsets = [0, 16], sizes = [16, 16], strides = [1, 1]} : vector<16x32xf32> to vector<16x16xf32>
    %20 = math.exp %19 : vector<16x16xf32>
    %21 = arith.mulf %20, %3 : vector<16x16xf32>
    %22 = arith.addf %18, %21 : vector<16x16xf32>
    %23 = arith.truncf %22 : vector<16x16xf32> to vector<16x16xbf16>
    %c0_10 = arith.constant 0 : index
    %c0_11 = arith.constant 0 : index
    %24 = vector.load %arg4[%c0_10, %c0_11] : memref<16x32xbf16, #tpu.memory_space<vmem>>, vector<16x32xbf16>
    %cst_12 = arith.constant dense<0.000000e+00> : vector<16x32xf32>
    %25 = tpu.matmul %23, %24, %cst_12 {dimension_numbers = #tpu.dot_dimension_numbers<[1], [0], [0], [1], [0, 0, 1, 1], [], []>} : vector<16x16xbf16>, vector<16x32xbf16>, vector<16x32xf32> -> vector<16x32xf32>
    %c0_13 = arith.constant 0 : index
    %c256 = arith.constant 256 : index
    %26 = vector.load %arg6[%c0_13, %c256] : memref<1x512xf32, #tpu.memory_space<vmem>>, vector<1x32xf32>
    %27 = vector.broadcast %26 : vector<1x32xf32> to vector<16x32xf32>
    %28 = arith.addf %25, %27 : vector<16x32xf32>
    %cst_14 = arith.constant 0.000000e+00 : f32
    %29 = vector.broadcast %cst_14 : f32 to vector<16x32xf32>
    %30 = arith.maximumf %28, %29 : vector<16x32xf32>
    %31 = arith.truncf %30 : vector<16x32xf32> to vector<16x32xbf16>
    %c0_15 = arith.constant 0 : index
    %c0_16 = arith.constant 0 : index
    %32 = vector.load %arg5[%c0_15, %c0_16] : memref<32x64xbf16, #tpu.memory_space<vmem>>, vector<32x64xbf16>
    %cst_17 = arith.constant dense<0.000000e+00> : vector<16x64xf32>
    %33 = tpu.matmul %31, %32, %cst_17 {dimension_numbers = #tpu.dot_dimension_numbers<[1], [0], [0], [1], [0, 0, 1, 1], [], []>} : vector<16x32xbf16>, vector<32x64xbf16>, vector<16x64xf32> -> vector<16x64xf32>
    %c0_18 = arith.constant 0 : index
    %c384 = arith.constant 384 : index
    %34 = vector.load %arg6[%c0_18, %c384] : memref<1x512xf32, #tpu.memory_space<vmem>>, vector<1x64xf32>
    %35 = vector.broadcast %34 : vector<1x64xf32> to vector<16x64xf32>
    %36 = arith.addf %33, %35 : vector<16x64xf32>
    %37 = math.absf %36 : vector<16x64xf32>
    %cst_19 = arith.constant 0.000000e+00 : f32
    %38 = vector.broadcast %cst_19 : f32 to vector<16x64xf32>
    %39 = arith.subf %38, %37 : vector<16x64xf32>
    %40 = math.exp %39 : vector<16x64xf32>
    %cst_20 = arith.constant 1.000000e+00 : f32
    %41 = vector.broadcast %cst_20 : f32 to vector<16x64xf32>
    %42 = arith.addf %41, %40 : vector<16x64xf32>
    %43 = tpu.reciprocal %42 {approx = true} : vector<16x64xf32> -> vector<16x64xf32>
    %cst_21 = arith.constant 0.000000e+00 : f32
    %44 = vector.broadcast %cst_21 : f32 to vector<16x64xf32>
    %45 = arith.cmpf oge, %36, %44 : vector<16x64xf32>
    %46 = arith.mulf %40, %43 : vector<16x64xf32>
    %47 = arith.select %45, %43, %46 : vector<16x64xi1>, vector<16x64xf32>
    %48 = math.log1p %40 : vector<16x64xf32>
    %49 = arith.mulf %18, %18 : vector<16x16xf32>
    %50 = arith.addf %20, %49 : vector<16x16xf32>
    %51 = arith.subf %50, %19 : vector<16x16xf32>
    %cst_22 = arith.constant 1.000000e+00 : f32
    %52 = vector.broadcast %cst_22 : f32 to vector<16x16xf32>
    %53 = arith.subf %51, %52 : vector<16x16xf32>
    %cst_23 = arith.constant dense<0.000000e+00> : vector<16xf32>
    %54 = vector.multi_reduction <add>, %53, %cst_23 [1] : vector<16x16xf32> to vector<16xf32>
    %55 = vector.shape_cast %54 : vector<16xf32> to vector<16x1xf32>
    %cst_24 = arith.constant 5.000000e-01 : f32
    %56 = vector.broadcast %cst_24 : f32 to vector<16x1xf32>
    %57 = arith.mulf %56, %55 : vector<16x1xf32>
    %cst_25 = arith.constant 0.000000e+00 : f32
    %58 = vector.broadcast %cst_25 : f32 to vector<16x64xf32>
    %59 = arith.maximumf %36, %58 : vector<16x64xf32>
    %60 = arith.mulf %36, %4 : vector<16x64xf32>
    %61 = arith.subf %59, %60 : vector<16x64xf32>
    %62 = arith.addf %61, %48 : vector<16x64xf32>
    %cst_26 = arith.constant dense<0.000000e+00> : vector<16xf32>
    %63 = vector.multi_reduction <add>, %62, %cst_26 [1] : vector<16x64xf32> to vector<16xf32>
    %64 = vector.shape_cast %63 : vector<16xf32> to vector<16x1xf32>
    %65 = arith.addf %64, %57 : vector<16x1xf32>
    %cst_27 = arith.constant 0.000000e+00 : f32
    %66 = vector.broadcast %cst_27 : f32 to vector<16x64xf32>
    %cst_28 = arith.constant 0.000000e+00 : f32
    %67 = vector.broadcast %cst_28 : f32 to vector<16x79xf32>
    %68 = tpu.concatenate %47, %66, %22, %17, %65, %67 in 1 : vector<16x64xf32>, vector<16x64xf32>, vector<16x16xf32>, vector<16x32xf32>, vector<16x1xf32>, vector<16x79xf32> -> vector<16x256xf32>
    %c0_29 = arith.constant 0 : index
    %c0_30 = arith.constant 0 : index
    %69 = vector.load %arg7[%c0_29, %c0_30] : memref<16x256xf32, #tpu.memory_space<vmem>>, vector<16x256xf32>
    tpu.vector_store %arg7[%c0_29, %c0_30], %68 {strides = array<i32>} : memref<16x256xf32, #tpu.memory_space<vmem>>, vector<16x256xf32>,
    return
  }
  func.func @transform_0(%arg0: i32) -> (i32, i32) {
    %c0_i32 = arith.constant 0 : i32
    %c0_i32_0 = arith.constant 0 : i32
    return %arg0, %c0_i32 : i32, i32
  }
  func.func @transform_1(%arg0: i32) -> (i32, i32) {
    %c0_i32 = arith.constant 0 : i32
    %c0_i32_0 = arith.constant 0 : i32
    %c0_i32_1 = arith.constant 0 : i32
    return %c0_i32, %c0_i32_0 : i32, i32
  }
  func.func @transform_2(%arg0: i32) -> (i32, i32) {
    %c0_i32 = arith.constant 0 : i32
    %c0_i32_0 = arith.constant 0 : i32
    %c0_i32_1 = arith.constant 0 : i32
    return %c0_i32, %c0_i32_0 : i32, i32
  }
  func.func @transform_3(%arg0: i32) -> (i32, i32) {
    %c0_i32 = arith.constant 0 : i32
    %c0_i32_0 = arith.constant 0 : i32
    %c0_i32_1 = arith.constant 0 : i32
    return %c0_i32, %c0_i32_0 : i32, i32
  }
  func.func @transform_4(%arg0: i32) -> (i32, i32) {
    %c0_i32 = arith.constant 0 : i32
    %c0_i32_0 = arith.constant 0 : i32
    %c0_i32_1 = arith.constant 0 : i32
    return %c0_i32, %c0_i32_0 : i32, i32
  }
  func.func @transform_5(%arg0: i32) -> (i32, i32) {
    %c0_i32 = arith.constant 0 : i32
    %c0_i32_0 = arith.constant 0 : i32
    %c0_i32_1 = arith.constant 0 : i32
    return %c0_i32, %c0_i32_0 : i32, i32
  }
  func.func @transform_6(%arg0: i32) -> (i32, i32) {
    %c0_i32 = arith.constant 0 : i32
    %c0_i32_0 = arith.constant 0 : i32
    return %arg0, %c0_i32 : i32, i32
  }
}

</mosaic_0001>

<bundles_post_ra>
// kernel: tpu_custom_call.1
= control target key start
LH: loop header
LB: loop body
LE: loop exit
PB: predicated region body
PF: predicated region fallthrough
CT: control target
= control target key end

     0   :  { %11 = vsyncpa [#allocation3], 0  ;;  %s1244_s0 = inlined_call_operand.vmem [shape: bf16[32,128], index: 0, kind: input, shape index: {}]   ;;  %s1245_s1 = inlined_call_operand.vmem [shape: bf16[64,32], index: 1, kind: input, shape index: {}]   ;;  %s1246_s2 = inlined_call_operand.vmem [shape: bf16[32,32], index: 2, kind: input, shape index: {}]   ;;  %s1247_s3 = inlined_call_operand.vmem [shape: bf16[16,32], index: 3, kind: input, shape index: {}]   ;;  %s1248_s4 = inlined_call_operand.vmem [shape: bf16[32,64], index: 4, kind: input, shape index: {}]   ;;  %s1249_s5 = inlined_call_operand.vmem [shape: f32[1,512], index: 5, kind: input, shape index: {}]   ;;  %s1250_s6 = inlined_call_operand.hbm [shape: f32[32,256], index: 6, kind: output, shape index: {}]  }
   0x1   :  { %13 = vsyncpa [#allocation3 + $0x1], 0  ;;  %s1021_s21 = smov 0   ;;  %s1023_s22 = smov 0  }
   0x2   :  { %s1025_s23 = smov 0   ;;  %s1027_s24 = smov 0  }
   0x3 LB: > { %s1042_s25 = sadd.s32 4294967295, %s977_s24   ;;  %s756_s26 = sadd.s32 4294967294, %s977_s24   ;;  %s977_s24 = sphi %s1027_s24, %s1256_s24   ;;  %s973_s23 = sphi %s1025_s23, %s1255_s23   ;;  %s969_s22 = sphi %s1023_s22, %s1254_s22   ;;  %s965_s21 = sphi %s1021_s21, %s1253_s21  }
   0x4   : > { %s1046_s27 = sadd.s32 1, %s977_s24   ;;  %s157_s28 = sadd.s32 1, %s973_s23 }
   0x5   : > { %s154_s29 = ssub.s32 %s977_s24, %s1046_s27  ;;  %p167_p0 = scmp.ne.s32.totalorder %s973_s23, %s969_s22 }
   0x6   : > { %p155_p1 = scmp.eq.s32.totalorder %s154_s29, 0  ;;  %p168_p2 = scmp.eq.s32.totalorder %s1042_s25, 1 }
   0x7   : > { %p173_p3 = scmp.ne.s32.totalorder %s969_s22, %s965_s21  ;;  %p174_p4 = scmp.eq.s32.totalorder %s756_s26, 1 }
   0x8   : > { %s1057_s30 = scalar_select %p155_p1, %s973_s23, %s157_s28  }
   0x9   : > { %p1059_p5 = por %p168_p2, %p167_p0  ;;  %p1063_p6 = por %p174_p4, %p173_p3 }
   0xa   : > { %p759_p7 = scmp.ge.s32.totalorder %s977_s24, 1  ;;  %p216_p8 = scmp.lt.s32.totalorder %s977_s24, 3 }
   0xc   : > { %p217_p9 = pnand %p759_p7, %p216_p8 }
   0xd   : > { %v888_v0 = vld [vmem:[%s1245_s1] sm:$0xff] (!%p217_p9)   ;;  %v979_v1 = vmov (!%p217_p9), 0.0   ;;  %v889_v2 = vld [vmem:[%s1245_s1 + $0x8] sm:$0xff] (!%p217_p9)   ;;  %vm980_vm0 = vmmov (!%p217_p9), 0   ;;  %s761_s13 = sshll.u32 (!%p217_p9), %s1042_s25, 1  ;;  %v890_v3 = vld [vmem:[%s1245_s1 + $0x10] sm:$0xff] (!%p217_p9)  }
   0xe   : > { %220 = sbr.rel (%p217_p9) target bundleno = 1237 (0x4d5), region = 44  ;;  %804 = vmatprep.subr.bf16.mxu0 (!%p217_p9), %v979_v1  ;;  %816 = vmatprep.subr.bf16.mxu1 (!%p217_p9), %v979_v1  ;;  %p247_p10 = scmp.lt.s32.totalorder (!%p217_p9), %s761_s13, 3  ;;  %v891_v4 = vld [vmem:[%s1245_s1 + $0x18] sm:$0xff] (!%p217_p9)   ;;  %vm302_vm1 = vcmask (!%p217_p9), 523264   ;;  %v893_v6 = vld [vmem:[%s1246_s2] sm:$0xff] (!%p217_p9)   ;;  %v894_v7 = vld [vmem:[%s1246_s2 + $0x8] sm:$0xff] (!%p217_p9)  }
   0xf   : > { %805 = vmatpush3.bf16.msra.mxu0 (!%p217_p9), %v888_v0  ;;  %812 = vmatprep.mubr.msk.bf16.mxu0 (!%p217_p9), %vm980_vm0, %v979_v1  ;;  %s981_s11 = smov (!%p217_p9), 80   ;;  %v763_v11 = vld [vmem:[%s1249_s5] ss:$0 sm:$0xff] (!%p217_p9)  ;;  %vm373_vm2 = vcmask (!%p217_p9), 261120   ;;  %v770_v22 = vld [vmem:[%s1249_s5 + $0x1] ss:$0 sm:$0xff] (!%p217_p9) }
  0x10   : > { %806 = vmatprep.subr.bf16.mxu0 (!%p217_p9), %v979_v1  ;;  %820 = vmatprep.mubr.msk.bf16.mxu1 (!%p217_p9), %vm980_vm0, %v979_v1  ;;  %v895_v21 = vld [vmem:[%s1247_s3] sm:$0xff] (!%p217_p9)   ;;  %s982_s18 = smov (!%p217_p9), 112   ;;  %vm458_vm3 = vcmask (!%p217_p9), 130048   ;;  %v897_v54 = vld [vmem:[%s1248_s4 + $0x8] sm:$0xff] (!%p217_p9)   ;;  %vm669_vm8 = vcmask (!%p217_p9), 392192   ;;  %vm672_vm9 = vcmask (!%p217_p9), 400384  }
  0x11   : > { %817 = vmatpush3.bf16.msra.mxu1 (!%p217_p9), %v893_v6  ;;  %v896_v53 = vld [vmem:[%s1248_s4] sm:$0xff] (!%p217_p9)   ;;  %s790_s17 = sshll.u32 (!%p217_p9), %s1042_s25, 9  ;;  %s984_s29 = smov (!%p217_p9), [#allocation2]  }
  0x12   : > { %818 = vmatprep.subr.bf16.mxu1 (!%p217_p9), %v979_v1  ;;  %v774_v59 = vld [vmem:[%s1249_s5 + $0x2] ss:$0 sm:$0xff] (!%p217_p9)  ;;  %v777_v6 = vld [vmem:[%s1249_s5 + $0x3] ss:$0 sm:$0xff] (!%p217_p9)  ;;  %s1197_s26 = scalar_lea.hbm (!%p217_p9), %s1250_s6, %s790_s17  ;;  %s919_s9 = sshll.u32 (!%p217_p9), %s984_s29, 4  ;;  %s920_s9 = int_to_ptr.vmem [resolvable:$false] %s919_s9 }
  0x13   : > { %807 = vmatpush3.bf16.msra.mxu0 (!%p217_p9), %v889_v2  ;;  %s921_s10 = scalar_lea.vmem (!%p217_p9), %s920_s9, 1024 }
  0x14   : > { %808 = vmatprep.subr.bf16.mxu0 (!%p217_p9), %v979_v1 }
  0x15   : > { %s1258_s13 = smov (!%p247_p10, %s761_s13), 3  ;;  %819 = vmatpush3.bf16.msra.mxu1 %v894_v7 }
  0x16   : > { %s762_s16 = sshll.u32 %s1258_s13, 2  ;;  %824 = vmatprep.subr.bf16.mxu1 %v979_v1  ;;  %s243_s13 = sand.u32 1, %s969_s22  }
  0x17   : > { %s250_s19 = scalar_lea.vmem %s1244_s0, %s762_s16  ;;  %809 = vmatpush3.bf16.msra.mxu0 %v890_v3  ;;  %s760_s14 = sshll.u32 %s243_s13, 5 }
  0x18   : > { %v1093_v5 = vld [vmem:[%s250_s19] sm:$0xff]   ;;  %810 = vmatprep.subr.bf16.mxu0 %v979_v1  ;;  %s983_s19 = smov 16   ;;  %s1174_s15 = scalar_lea.vmem [#allocation2], %s760_s14 }
  0x19   : > { %v256_v8 = vunpack.c.l.bf16 %v1093_v5  ;;  %v257_v9 = vunpack.c.h.bf16 %v1093_v5  ;;  %s694_s16 = sshll.u32 %s1174_s15, 4  ;;  %s1202_s25 = scalar_lea.sflag [#allocation3], %s243_s13  ;;  %s1189_s16 = int_to_ptr.vmem [resolvable:$true] %s694_s16 }
  0x1a   : > { %s915_s28 = scalar_lea.vmem %s1189_s16, 512  ;;  %p922_p0 = scmp.lt.s32.totalorder %s1189_s16, %s920_s9 }
  0x1b   : > { %811 = vmatpush3.bf16.msra.mxu0 %v891_v4  ;;  %v883_v10 = vpack.i.bf16 %v257_v9, %v256_v8  ;;  %p916_p11 = scmp.ne.s32.totalorder %s1189_s16, %s915_s28  ;;  %p923_p1 = scmp.lt.s32.totalorder %s921_s10, %s915_s28 }
  0x1c   : > { %830 = vmatprep.subr.bf16.mxu0 %v979_v1 }
  0x1d   : > { %884 = vrot.lane.b32.xlu0 %v883_v10, %s981_s11  ;;  %p917_p12 = pnand %p916_p11, %p1059_p5  ;;  %p924_p2 = por %p923_p1, %p922_p0 }
  0x1e   : > { %813 = vmatmul.mubr.msk.bf16.vlgmr.msra.gmra.mrb[0].mxu0 %vm302_vm1, %v1093_v5 }
  0x1f   : > { %834 = vmatprep.mubr.msk.bf16.mxu0 %vm980_vm0, %v979_v1  ;;  %831 = vmatpush3.bf16.msra.mxu0 %v896_v53  ;;  %p918_p13 = pneg %p917_p12 }
  0x20   : > { %832 = vmatprep.subr.bf16.mxu0 %v979_v1 }
  0x21   : > { %p925_p3 = pnand %p924_p2, %p918_p13 }
  0x23   : > { %833 = vmatpush3.bf16.msra.mxu0 %v897_v54 }
  0x8f   : > { %v885_v31 = vpop.permute.xlu0 %884 }
  0x90   : > { %v886_v32 = vunpack.i.l.bf16 %v885_v31  ;;  %v887_v33 = vunpack.i.h.bf16 %v885_v31 }
  0xf1   : > { %v340_v12 = vpop.f32.mrb[0].mxu0 }
  0xf2   : > { %v341_v13 = vadd.f32 %v763_v11, %v340_v12  ;;  %v814_v14 = vpop.f32.mrb[1].mxu0 }
  0xf3   : > { %v343_v15 = vpop.f32.mrb[2].mxu0 }
  0xf4   : > { %v344_v16 = vadd.f32 %v763_v11, %v343_v15  ;;  %v815_v17 = vpop.f32.mrb[3].mxu0  ;;  %v347_v18 = vmax.f32 %v341_v13, 0.0 }
  0xf6   : > { %v348_v19 = vmax.f32 %v344_v16, 0.0 }
  0xf8   : > { %v349_v20 = vpack.c.bf16 %v348_v19, %v347_v18 }
  0xfa   : > { %821 = vmatmul.mubr.msk.bf16.vlgmr.msra.gmra.mrb[0].mxu1 %vm373_vm2, %v349_v20 }
  0xfb   : > { %826 = vmatprep.mubr.msk.bf16.mxu1 %vm980_vm0, %v979_v1  ;;  %825 = vmatpush3.bf16.msra.mxu1 %v895_v21 }
 0x1cd   : > { %v411_v23 = vpop.f32.mrb[0].mxu1 }
 0x1ce   : > { %v1127_v24 = vadd.f32 %v770_v22, %v411_v23  ;;  %v822_v25 = vpop.f32.mrb[1].mxu1 }
 0x1cf   : > { %v414_v26 = vpop.f32.mrb[2].mxu1 }
 0x1d0   : > { %v418_v27 = vmul.f32 1.442695, %v1127_v24  ;;  %v1130_v28 = vadd.f32 %v770_v22, %v414_v26  ;;  %v823_v29 = vpop.f32.mrb[3].mxu1  ;;  %v609_v39 = vmul.f32 %v1127_v24, %v1127_v24 }
 0x1d2   : > { %899 = vpow2.f32 %v418_v27  ;;  %v420_v30 = vmul.f32 1.442695, %v1130_v28  ;;  %v610_v38 = vmul.f32 %v1130_v28, %v1130_v28 }
 0x1d4   : > { %901 = vpow2.f32 %v420_v30 }
 0x1dc   : > { %v900_v34 = vpop.eup %899 }
 0x1dd   : > { %v430_v35 = vmul.f32 %v900_v34, %v886_v32 }
 0x1de   : > { %v902_v36 = vpop.eup %901 }
 0x1df   : > { %434 = vrot.lane.b32.xlu0 %v430_v35, %s982_s18  ;;  %v431_v37 = vmul.f32 %v902_v36, %v887_v33 }
 0x1e1   : > { %436 = vrot.lane.b32.xlu1 %v431_v37, %s982_s18 }
 0x1e3   : > { %615 = vrot.lane.b32.xlu0 %v610_v38, %s983_s19 }
 0x1e5   : > { %613 = vrot.lane.b32.xlu1 %v609_v39, %s983_s19 }
 0x251   : > { %v435_v40 = vpop.permute.xlu0 %434 }
 0x252   : > { %v1140_v42 = vadd.f32 %v435_v40, %v1127_v24 }
 0x253   : > { %v437_v41 = vpop.permute.xlu1 %436 }
 0x254   : > { %v1143_v43 = vadd.f32 %v437_v41, %v1130_v28 }
 0x255   : > { %v616_v44 = vpop.permute.xlu0 %615 }
 0x256   : > { %v442_v45 = vpack.c.bf16 %v1143_v43, %v1140_v42  ;;  %v620_v46 = vadd.f32 %v902_v36, %v616_v44 }
 0x257   : > { %v614_v47 = vpop.permute.xlu1 %613 }
 0x258   : > { %v622_v48 = vsub.f32 %v620_v46, %v1130_v28  ;;  %v619_v49 = vadd.f32 %v900_v34, %v614_v47  ;;  %827 = vmatmul.mubr.msk.bf16.vlgmr.msra.gmra.mrb[4].mxu1 %vm458_vm3, %v442_v45 }
 0x25a   : > { %v782_v50 = vadd.f32 -1.0, %v622_v48  ;;  %v621_v51 = vsub.f32 %v619_v49, %v1127_v24 }
 0x25c   : > { %v781_v52 = vadd.f32 -1.0, %v621_v51  ;;  %629 = vrot.lane.b32.xlu0 %v782_v50, %s982_s18 }
 0x25e   : > { %627 = vrot.lane.b32.xlu1 %v781_v52, %s982_s18 }
 0x2ce   : > { %v630_v55 = vpop.permute.xlu0 %629 }
 0x2cf   : > { %v636_v56 = vsel %vm458_vm3, %v630_v55, 0.0 }
 0x2d0   : > { %v628_v57 = vpop.permute.xlu1 %627  ;;  %637 = vadd.xlane.f32.xlu0 %v636_v56 }
 0x2d1   : > { %v633_v58 = vsel %vm458_vm3, %v628_v57, 0.0 }
 0x2d2   : > { %634 = vadd.xlane.f32.xlu1 %v633_v58 }
 0x32b   : > { %v496_v60 = vpop.f32.mrb[4].mxu1 }
 0x32c   : > { %v497_v61 = vadd.f32 %v774_v59, %v496_v60  ;;  %v828_v62 = vpop.f32.mrb[5].mxu1 }
 0x32d   : > { %v499_v63 = vpop.f32.mrb[6].mxu1 }
 0x32e   : > { %v500_v0 = vadd.f32 %v774_v59, %v499_v63  ;;  %v829_v1 = vpop.f32.mrb[7].mxu1  ;;  %v503_v2 = vmax.f32 %v497_v61, 0.0 }
 0x330   : > { %v504_v3 = vmax.f32 %v500_v0, 0.0 }
 0x332   : > { %v505_v4 = vpack.c.bf16 %v504_v3, %v503_v2 }
 0x334   : > { %835 = vmatmul.mubr.msk.bf16.vlgmr.msra.gmra.mrb[4].mxu0 %vm373_vm2, %v505_v4 }
 0x35d   : > { %v638_v58 = vpop.xlane.xlu0 %637 }
 0x35e   : > { %v640_v63 = vmul.f32 0.5, %v638_v58 }
 0x35f   : > { %v635_v59 = vpop.xlane.xlu1 %634 }
 0x360   : > { %v639_v61 = vmul.f32 0.5, %v635_v59 }
 0x407   : > { %v566_v7 = vpop.f32.mrb[4].mxu0 }
 0x408   : > { %v567_v10 = vadd.f32 %v777_v6, %v566_v7  ;;  %v836_v11 = vpop.f32.mrb[5].mxu0 }
 0x409   : > { %v569_v12 = vpop.f32.mrb[6].mxu0 }
 0x40a   : > { %v573_v13 = vand.u32 2147483647, %v567_v10  ;;  %v570_v14 = vadd.f32 %v777_v6, %v569_v12  ;;  %v837_v15 = vpop.f32.mrb[7].mxu0  ;;  %v641_v31 = vmax.f32 %v567_v10, 0.0  ;;  %v643_v32 = vmul.f32 %v567_v10, %v256_v8 }
 0x40b   : > { %vm585_vm4 = vcmp.ge.f32.partialorder %v567_v10, 0.0 }
 0x40c   : > { %v575_v16 = vsub.f32 0.0, %v573_v13  ;;  %v574_v17 = vand.u32 2147483647, %v570_v14  ;;  %v642_v38 = vmax.f32 %v570_v14, 0.0  ;;  %v644_v39 = vmul.f32 %v570_v14, %v257_v9 }
 0x40d   : > { %vm586_vm5 = vcmp.ge.f32.partialorder %v570_v14, 0.0  ;;  %v645_v8 = vsub.f32 %v641_v31, %v643_v32 }
 0x40e   : > { %v577_v18 = vmul.f32 1.442695, %v575_v16  ;;  %v576_v19 = vsub.f32 0.0, %v574_v17  ;;  %v646_v5 = vsub.f32 %v642_v38, %v644_v39 }
 0x410   : > { %903 = vpow2.f32 %v577_v18  ;;  %v579_v20 = vmul.f32 1.442695, %v576_v19 }
 0x412   : > { %905 = vpow2.f32 %v579_v20 }
 0x41a   : > { %v904_v21 = vpop.eup %903 }
 0x41b   : > { %v581_v22 = vadd.f32 1.0, %v904_v21  ;;  %v594_v26 = vmul.f32 -0.5, %v904_v21  ;;  %v597_v30 = vand.u32 2147483647, %v904_v21 }
 0x41c   : > { %v906_v23 = vpop.eup %905 }
 0x41d   : > { %907 = vrcp.f32 %v581_v22  ;;  %v582_v25 = vadd.f32 1.0, %v906_v23  ;;  %v603_v27 = vmul.f32 -0.5, %v906_v23  ;;  %v595_v29 = vadd.f32 1.0, %v594_v26 }
 0x41e   : > { %909 = vlog2.f32 %v581_v22  ;;  %v606_v37 = vand.u32 2147483647, %v906_v23  ;;  %vm598_vm6 = vcmp.lt.f32.partialorder %v597_v30, 0.0004427343 }
 0x41f   : > { %911 = vrcp.f32 %v582_v25  ;;  %v604_v34 = vadd.f32 1.0, %v603_v27  ;;  %v596_v44 = vmul.f32 %v904_v21, %v595_v29 }
 0x420   : > { %913 = vlog2.f32 %v582_v25  ;;  %vm607_vm7 = vcmp.lt.f32.partialorder %v606_v37, 0.0004427343 }
 0x421   : > { %v605_v51 = vmul.f32 %v906_v23, %v604_v34 }
 0x427   : > { %v908_v33 = vpop.eup %907 }
 0x428   : > { %v910_v35 = vpop.eup %909  ;;  %v587_v36 = vmul.f32 %v908_v33, %v904_v21 }
 0x429   : > { %v912_v40 = vpop.eup %911  ;;  %v593_v41 = vmul.f32 0.6931472, %v910_v35 }
 0x42a   : > { %v914_v45 = vpop.eup %913  ;;  %v589_v46 = vsel %vm585_vm4, %v908_v33, %v587_v36  ;;  %v588_v47 = vmul.f32 %v912_v40, %v906_v23 }
 0x42b   : > { %v665_v48 = vsel %vm302_vm1, %v589_v46, 0.0  ;;  %v599_v49 = vsel %vm598_vm6, %v596_v44, %v593_v41  ;;  %v602_v50 = vmul.f32 0.6931472, %v914_v45 }
 0x42c   : > { %v590_v52 = vsel %vm586_vm5, %v912_v40, %v588_v47  ;;  %v647_v53 = vadd.f32 %v645_v8, %v599_v49  ;;  %675 = vst [vmem:[%s1174_s15] sm:$0xff] %v665_v48 }
 0x42d   : > { %v666_v9 = vsel %vm302_vm1, %v590_v52, 0.0  ;;  %v608_v54 = vsel %vm607_vm7, %v605_v51, %v602_v50 }
 0x42e   : > { %v649_v55 = vsel %vm302_vm1, %v647_v53, 0.0  ;;  %v648_v56 = vadd.f32 %v646_v5, %v608_v54  ;;  %677 = vst [vmem:[%s1174_s15 + $0x10] sm:$0xff] %v666_v9 }
 0x42f   : > { %650 = vadd.xlane.f32.xlu0 %v649_v55 }
 0x430   : > { %v652_v57 = vsel %vm302_vm1, %v648_v56, 0.0 }
 0x431   : > { %653 = vadd.xlane.f32.xlu1 %v652_v57 }
 0x442   : > { %661 = vrot.lane.b32.xlu1 %v1130_v28, %s983_s19 }
 0x445   : > { %659 = vrot.lane.b32.xlu0 %v1127_v24, %s983_s19 }
 0x4bc   : > { %v651_v60 = vpop.xlane.xlu0 %650 }
 0x4bd   : > { %v655_v0 = vadd.f32 %v651_v60, %v639_v61 }
 0x4be   : > { %v654_v62 = vpop.xlane.xlu1 %653 }
 0x4bf   : > { %v656_v24 = vadd.f32 %v654_v62, %v640_v63 }
 0x4c0   : > { %v660_v1 = vpop.permute.xlu0 %659 }
 0x4c1   : > { %v667_v28 = vsel %vm458_vm3, %v1140_v42, %v660_v1 }
 0x4c2   : > { %v670_v2 = vsel %vm669_vm8, %v667_v28, %v655_v0  ;;  %v662_v3 = vpop.permute.xlu1 %661 }
 0x4c3   : > { %v673_v4 = vsel %vm672_vm9, %v670_v2, 0.0  ;;  %v668_v6 = vsel %vm458_vm3, %v1143_v43, %v662_v3 }
 0x4c4   : > { %676 = vst [vmem:[%s1174_s15 + $0x8] sm:$0xff] %v673_v4  ;;  %v671_v7 = vsel %vm669_vm8, %v668_v6, %v656_v24 }
 0x4c5   : > { %v674_v42 = vsel %vm672_vm9, %v671_v7, 0.0 }
 0x4c6   : > { %678 = vst [vmem:[%s1174_s15 + $0x18] sm:$0xff] %v674_v42 }
 0x4c7   : > { %928 = shalt.err (!%p925_p3)
}
 0x4c8   : > { %s929_s11 = scalar_lea.hbm %s1197_s26, 512  ;;  %s933_s14 = scalar_lea.hbm %s1250_s6, 1024 }
 0x4c9   : > { %p930_p4 = scmp.ne.s32.totalorder %s1197_s26, %s929_s11  ;;  %p934_p9 = scmp.lt.u32.totalorder %s1197_s26, %s1250_s6 }
 0x4ca   : > { %p935_p10 = scmp.lt.u32.totalorder %s933_s14, %s929_s11  ;;  %p937_p12 = scmp.lt.u32.totalorder %s929_s11, %s1197_s26 }
 0x4cb   : > { %p931_p7 = pnand %p930_p4, %p1059_p5 }
 0x4cc   : > { %p936_p11 = por %p935_p10, %p934_p9 }
 0x4cd   : > { %p932_p8 = pneg %p931_p7 }
 0x4ce   : > { %p938_p13 = por %p937_p12, %p936_p11 }
 0x4d0   : > { %p939_p0 = pnand %p938_p13, %p932_p8 }
 0x4d2   : > { %942 = shalt.err (!%p939_p0)
}
 0x4d3   : > { %s985_s18 = smov 256  }
 0x4d4   : > { %838 = dma.vmem_to_hbm [thread:$0]  (%p1059_p5), %s1189_s16, 512, %s1197_s26, %s1202_s25, %s985_s18, %s985_s18, %s983_s19  }
 0x4d5 PF: > { %p844_p1 = scmp.ge.s32.totalorder %s977_s24, 2  ;;  %s709_s20 = sand.u32 1, %s965_s21  }
 0x4d6   : > { %s710_s28 = scalar_lea.sflag [#allocation3], %s709_s20 }
 0x4d7   : > { %p841_p2 = pnand %p844_p1, %p1063_p6 }
 0x4d9   : > { %960 = dma.done.wait (!%p841_p2), %s710_s28, 512  }
 0x4da   : > { %962 = vsyncadd (!%p841_p2), %s710_s28, 4294966784  ;;  %p16_p3 = scmp.ge.s32.totalorder %s1046_s27, 4   ;;  %s1253_s21 = smov %s969_s22 }
 0x4db   : > { %s1254_s22 = smov %s973_s23  ;;  %s1255_s23 = smov %s1057_s30 }
 0x4dc   : > { %s1256_s24 = smov %s1046_s27  ;;  %18 = sbr.rel (!%p16_p3) target bundleno = 3 (0x3), region = 79 }
 0x4e3   :  { %715 = vsyncpa [#allocation3], 1 }
 0x4e4   :  { %717 = vsyncpa [#allocation3 + $0x1], 1 }

</bundles_post_ra>
